<compile_context>
chip_gen: v7x
topology: tpu7x:2x2x1
jax: 0.10.0
libtpu: 0.0.40
codegen_flags: <defaults>
</compile_context>

<pallas_src>
import functools

import jax
import jax.numpy as jnp
from jax import lax
from jax.experimental import pallas as pl
from jax.experimental.pallas import tpu as pltpu


def _make_lstm6_kernel(T: int, B: int, H: int):
    def kernel(x_ref, wih_ref, whh_ref, b_ref, out_ref):
        # x_ref:   (T*B, I)  time-major flattened input
        # wih_ref: (I, 4H)   weight_ih_l0.T, gate columns permuted to [i, f, o, g]
        # whh_ref: (H, 4H)   weight_hh_l0.T, same permutation
        # b_ref:   (1, 4H)   (bias_ih + bias_hh), same permutation
        # out_ref: (B, H)    last hidden state h_n[-1]
        whh = whh_ref[...]

        # Hoisted input projection for every timestep (+ bias, broadcast once).
        xproj = (
            jnp.dot(x_ref[...], wih_ref[...], preferred_element_type=jnp.float32)
            + b_ref[...]
        )  # (T*B, 4H)

        h = jnp.zeros((B, H), jnp.float32)
        c = jnp.zeros((B, H), jnp.float32)

        # Fully unrolled recurrence (T is a small static trip count).
        for t in range(T):
            gates = xproj[t * B:(t + 1) * B, :] + jnp.dot(
                h, whh, preferred_element_type=jnp.float32
            )  # (B, 4H) in [i, f, o, g] order
            sig = jax.nn.sigmoid(gates[:, : 3 * H])     # i, f, o in one pass
            g_g = jnp.tanh(gates[:, 3 * H:])            # g
            i_g = sig[:, :H]
            f_g = sig[:, H:2 * H]
            o_g = sig[:, 2 * H:3 * H]
            c = f_g * c + i_g * g_g
            h = o_g * jnp.tanh(c)

        out_ref[...] = h

    return kernel


def lstm6_forward(x, w_ih, w_hh, b_ih, b_hh, height, width):
    """x: (B, T, *spatial); w_ih: (4H, I); w_hh: (4H, H); b_*: (4H,).

    Returns de_input of shape (B, 1, height, width), i.e. the decoder input
    of Lstm6.forward (the external decoder itself is not part of the kernel).
    """
    B, T = x.shape[0], x.shape[1]
    x3 = x.reshape(B, T, -1).astype(jnp.float32)          # x.view(B, T, -1)
    I = x3.shape[-1]
    H = w_hh.shape[1]
    assert H == height * width, "view(-1, 1, height, width) requires hidden == height*width"

    # Time-major, pre-flattened so each step's rows are a static contiguous slice.
    x_tm = jnp.swapaxes(x3, 0, 1).reshape(T * B, I)       # (T*B, I)

    # Right-multiply form; permute gate columns [i, f, g, o] -> [i, f, o, g]
    # so sigmoid/tanh each act on one contiguous slice inside the kernel.
    perm = jnp.concatenate(
        [jnp.arange(0, 2 * H), jnp.arange(3 * H, 4 * H), jnp.arange(2 * H, 3 * H)]
    )
    wih_t = jnp.transpose(w_ih).astype(jnp.float32)[:, perm]        # (I, 4H)
    whh_t = jnp.transpose(w_hh).astype(jnp.float32)[:, perm]        # (H, 4H)
    bias = (b_ih + b_hh).astype(jnp.float32)[perm].reshape(1, 4 * H)  # (1, 4H)

    kernel = _make_lstm6_kernel(T, B, H)
    h_last = pl.pallas_call(
        kernel,
        out_shape=jax.ShapeDtypeStruct((B, H), jnp.float32),
        in_specs=[pl.BlockSpec(memory_space=pltpu.MemorySpace.VMEM)] * 4,
        out_specs=pl.BlockSpec(memory_space=pltpu.MemorySpace.VMEM),
    )(x_tm, wih_t, whh_t, bias)

    de_input = h_last.reshape(-1, 1, height, width)
    # TODO(synk): self.decoder is an external, unspecified nn.Module passed at
    # construction; it has no Pallas equivalent here, so the decoder input is
    # returned (identity decoder).
    return de_input


def lstm6_reference(x, w_ih, w_hh, b_ih, b_hh, height, width):
    """Pure-JAX reference matching PyTorch nn.LSTM semantics (correctness check)."""
    B, T = x.shape[0], x.shape[1]
    x3 = x.reshape(B, T, -1).astype(jnp.float32)
    H = w_hh.shape[1]
    bias = b_ih + b_hh

    def step(carry, x_t):
        h, c = carry
        gates = x_t @ w_ih.T + h @ w_hh.T + bias
        i = jax.nn.sigmoid(gates[:, :H])
        f = jax.nn.sigmoid(gates[:, H:2 * H])
        g = jnp.tanh(gates[:, 2 * H:3 * H])
        o = jax.nn.sigmoid(gates[:, 3 * H:])
        c = f * c + i * g
        h = o * jnp.tanh(c)
        return (h, c), None

    init = (jnp.zeros((B, H), jnp.float32), jnp.zeros((B, H), jnp.float32))
    (h_last, _), _ = lax.scan(step, init, jnp.swapaxes(x3, 0, 1))
    return h_last.reshape(-1, 1, height, width)


if __name__ == "__main__":
    # Small shapes consistent with the module's forward:
    #   x: (batch, seq, channels, spatial) -> flattened to input_size = channels*spatial
    #   hidden (output_size) must equal height*width for view(-1, 1, height, width).
    batch, seq = 2, 8
    channels, spatial = 4, 16
    input_size = channels * spatial       # 64
    height, width = 8, 4
    output_size = height * width          # 32 = LSTM hidden size

    key = jax.random.PRNGKey(0)
    k_x, k_wih, k_whh, k_bih, k_bhh = jax.random.split(key, 5)

    k = 1.0 / jnp.sqrt(output_size)
    x = jax.random.normal(k_x, (batch, seq, channels, spatial), jnp.float32)
    w_ih = jax.random.uniform(k_wih, (4 * output_size, input_size), jnp.float32, -k, k)
    w_hh = jax.random.uniform(k_whh, (4 * output_size, output_size), jnp.float32, -k, k)
    b_ih = jax.random.uniform(k_bih, (4 * output_size,), jnp.float32, -k, k)
    b_hh = jax.random.uniform(k_bhh, (4 * output_size,), jnp.float32, -k, k)

    out = lstm6_forward(x, w_ih, w_hh, b_ih, b_hh, height, width)
    out = jax.block_until_ready(out)

    ref = lstm6_reference(x, w_ih, w_hh, b_ih, b_hh, height, width)
    assert out.shape == (batch, 1, height, width), out.shape
    assert jnp.allclose(out, ref, atol=1e-5, rtol=1e-5), float(jnp.max(jnp.abs(out - ref)))

    print("KERNEL_OK")
</pallas_src>

<mosaic_0001>
module attributes {stable_mosaic.version = 11 : i64} {
  func.func @kernel(%arg0: memref<16x64xf32, #tpu.memory_space<vmem>>, %arg1: memref<64x128xf32, #tpu.memory_space<vmem>>, %arg2: memref<32x128xf32, #tpu.memory_space<vmem>>, %arg3: memref<1x128xf32, #tpu.memory_space<vmem>>, %arg4: memref<2x32xf32, #tpu.memory_space<vmem>>) attributes {dimension_semantics = [], scalar_prefetch = 0 : i64, scratch_operands = 0 : i64, tpu.core_type = #tpu.core_type<tc>} {
    %c0 = arith.constant 0 : index
    %c0_0 = arith.constant 0 : index
    %0 = vector.load %arg2[%c0, %c0_0] : memref<32x128xf32, #tpu.memory_space<vmem>>, vector<32x128xf32>
    %c0_1 = arith.constant 0 : index
    %c0_2 = arith.constant 0 : index
    %1 = vector.load %arg0[%c0_1, %c0_2] : memref<16x64xf32, #tpu.memory_space<vmem>>, vector<16x64xf32>
    %c0_3 = arith.constant 0 : index
    %c0_4 = arith.constant 0 : index
    %2 = vector.load %arg1[%c0_3, %c0_4] : memref<64x128xf32, #tpu.memory_space<vmem>>, vector<64x128xf32>
    %cst = arith.constant dense<0.000000e+00> : vector<16x128xf32>
    %3 = tpu.matmul %1, %2, %cst {dimension_numbers = #tpu.dot_dimension_numbers<[1], [0], [0], [1], [0, 0, 1, 1], [], []>} : vector<16x64xf32>, vector<64x128xf32>, vector<16x128xf32> -> vector<16x128xf32>
    %c0_5 = arith.constant 0 : index
    %c0_6 = arith.constant 0 : index
    %4 = vector.load %arg3[%c0_5, %c0_6] : memref<1x128xf32, #tpu.memory_space<vmem>>, vector<1x128xf32>
    %5 = vector.broadcast %4 : vector<1x128xf32> to vector<16x128xf32>
    %6 = arith.addf %3, %5 : vector<16x128xf32>
    %cst_7 = arith.constant 0.000000e+00 : f32
    %7 = vector.broadcast %cst_7 : f32 to vector<2x32xf32>
    %cst_8 = arith.constant 0.000000e+00 : f32
    %8 = vector.broadcast %cst_8 : f32 to vector<2x32xf32>
    %9 = vector.extract_strided_slice %6 {offsets = [0, 0], sizes = [2, 128], strides = [1, 1]} : vector<16x128xf32> to vector<2x128xf32>
    %cst_9 = arith.constant dense<0.000000e+00> : vector<2x128xf32>
    %10 = tpu.matmul %7, %0, %cst_9 {dimension_numbers = #tpu.dot_dimension_numbers<[1], [0], [0], [1], [0, 0, 1, 1], [], []>} : vector<2x32xf32>, vector<32x128xf32>, vector<2x128xf32> -> vector<2x128xf32>
    %11 = arith.addf %9, %10 : vector<2x128xf32>
    %12 = vector.extract_strided_slice %11 {offsets = [0, 0], sizes = [2, 96], strides = [1, 1]} : vector<2x128xf32> to vector<2x96xf32>
    %13 = arith.negf %12 : vector<2x96xf32>
    %14 = math.exp %13 : vector<2x96xf32>
    %cst_10 = arith.constant 1.000000e+00 : f32
    %15 = vector.broadcast %cst_10 : f32 to vector<2x96xf32>
    %16 = arith.addf %15, %14 : vector<2x96xf32>
    %17 = arith.divf %15, %16 : vector<2x96xf32>
    %18 = vector.extract_strided_slice %11 {offsets = [0, 96], sizes = [2, 32], strides = [1, 1]} : vector<2x128xf32> to vector<2x32xf32>
    %19 = math.tanh %18 : vector<2x32xf32>
    %20 = vector.extract_strided_slice %17 {offsets = [0, 0], sizes = [2, 32], strides = [1, 1]} : vector<2x96xf32> to vector<2x32xf32>
    %21 = vector.extract_strided_slice %17 {offsets = [0, 32], sizes = [2, 32], strides = [1, 1]} : vector<2x96xf32> to vector<2x32xf32>
    %22 = vector.extract_strided_slice %17 {offsets = [0, 64], sizes = [2, 32], strides = [1, 1]} : vector<2x96xf32> to vector<2x32xf32>
    %23 = arith.mulf %21, %8 : vector<2x32xf32>
    %24 = arith.mulf %20, %19 : vector<2x32xf32>
    %25 = arith.addf %23, %24 : vector<2x32xf32>
    %26 = math.tanh %25 : vector<2x32xf32>
    %27 = arith.mulf %22, %26 : vector<2x32xf32>
    %28 = vector.extract_strided_slice %6 {offsets = [2, 0], sizes = [2, 128], strides = [1, 1]} : vector<16x128xf32> to vector<2x128xf32>
    %cst_11 = arith.constant dense<0.000000e+00> : vector<2x128xf32>
    %29 = tpu.matmul %27, %0, %cst_11 {dimension_numbers = #tpu.dot_dimension_numbers<[1], [0], [0], [1], [0, 0, 1, 1], [], []>} : vector<2x32xf32>, vector<32x128xf32>, vector<2x128xf32> -> vector<2x128xf32>
    %30 = arith.addf %28, %29 : vector<2x128xf32>
    %31 = vector.extract_strided_slice %30 {offsets = [0, 0], sizes = [2, 96], strides = [1, 1]} : vector<2x128xf32> to vector<2x96xf32>
    %32 = arith.negf %31 : vector<2x96xf32>
    %33 = math.exp %32 : vector<2x96xf32>
    %cst_12 = arith.constant 1.000000e+00 : f32
    %34 = vector.broadcast %cst_12 : f32 to vector<2x96xf32>
    %35 = arith.addf %34, %33 : vector<2x96xf32>
    %36 = arith.divf %34, %35 : vector<2x96xf32>
    %37 = vector.extract_strided_slice %30 {offsets = [0, 96], sizes = [2, 32], strides = [1, 1]} : vector<2x128xf32> to vector<2x32xf32>
    %38 = math.tanh %37 : vector<2x32xf32>
    %39 = vector.extract_strided_slice %36 {offsets = [0, 0], sizes = [2, 32], strides = [1, 1]} : vector<2x96xf32> to vector<2x32xf32>
    %40 = vector.extract_strided_slice %36 {offsets = [0, 32], sizes = [2, 32], strides = [1, 1]} : vector<2x96xf32> to vector<2x32xf32>
    %41 = vector.extract_strided_slice %36 {offsets = [0, 64], sizes = [2, 32], strides = [1, 1]} : vector<2x96xf32> to vector<2x32xf32>
    %42 = arith.mulf %40, %25 : vector<2x32xf32>
    %43 = arith.mulf %39, %38 : vector<2x32xf32>
    %44 = arith.addf %42, %43 : vector<2x32xf32>
    %45 = math.tanh %44 : vector<2x32xf32>
    %46 = arith.mulf %41, %45 : vector<2x32xf32>
    %47 = vector.extract_strided_slice %6 {offsets = [4, 0], sizes = [2, 128], strides = [1, 1]} : vector<16x128xf32> to vector<2x128xf32>
    %cst_13 = arith.constant dense<0.000000e+00> : vector<2x128xf32>
    %48 = tpu.matmul %46, %0, %cst_13 {dimension_numbers = #tpu.dot_dimension_numbers<[1], [0], [0], [1], [0, 0, 1, 1], [], []>} : vector<2x32xf32>, vector<32x128xf32>, vector<2x128xf32> -> vector<2x128xf32>
    %49 = arith.addf %47, %48 : vector<2x128xf32>
    %50 = vector.extract_strided_slice %49 {offsets = [0, 0], sizes = [2, 96], strides = [1, 1]} : vector<2x128xf32> to vector<2x96xf32>
    %51 = arith.negf %50 : vector<2x96xf32>
    %52 = math.exp %51 : vector<2x96xf32>
    %cst_14 = arith.constant 1.000000e+00 : f32
    %53 = vector.broadcast %cst_14 : f32 to vector<2x96xf32>
    %54 = arith.addf %53, %52 : vector<2x96xf32>
    %55 = arith.divf %53, %54 : vector<2x96xf32>
    %56 = vector.extract_strided_slice %49 {offsets = [0, 96], sizes = [2, 32], strides = [1, 1]} : vector<2x128xf32> to vector<2x32xf32>
    %57 = math.tanh %56 : vector<2x32xf32>
    %58 = vector.extract_strided_slice %55 {offsets = [0, 0], sizes = [2, 32], strides = [1, 1]} : vector<2x96xf32> to vector<2x32xf32>
    %59 = vector.extract_strided_slice %55 {offsets = [0, 32], sizes = [2, 32], strides = [1, 1]} : vector<2x96xf32> to vector<2x32xf32>
    %60 = vector.extract_strided_slice %55 {offsets = [0, 64], sizes = [2, 32], strides = [1, 1]} : vector<2x96xf32> to vector<2x32xf32>
    %61 = arith.mulf %59, %44 : vector<2x32xf32>
    %62 = arith.mulf %58, %57 : vector<2x32xf32>
    %63 = arith.addf %61, %62 : vector<2x32xf32>
    %64 = math.tanh %63 : vector<2x32xf32>
    %65 = arith.mulf %60, %64 : vector<2x32xf32>
    %66 = vector.extract_strided_slice %6 {offsets = [6, 0], sizes = [2, 128], strides = [1, 1]} : vector<16x128xf32> to vector<2x128xf32>
    %cst_15 = arith.constant dense<0.000000e+00> : vector<2x128xf32>
    %67 = tpu.matmul %65, %0, %cst_15 {dimension_numbers = #tpu.dot_dimension_numbers<[1], [0], [0], [1], [0, 0, 1, 1], [], []>} : vector<2x32xf32>, vector<32x128xf32>, vector<2x128xf32> -> vector<2x128xf32>
    %68 = arith.addf %66, %67 : vector<2x128xf32>
    %69 = vector.extract_strided_slice %68 {offsets = [0, 0], sizes = [2, 96], strides = [1, 1]} : vector<2x128xf32> to vector<2x96xf32>
    %70 = arith.negf %69 : vector<2x96xf32>
    %71 = math.exp %70 : vector<2x96xf32>
    %cst_16 = arith.constant 1.000000e+00 : f32
    %72 = vector.broadcast %cst_16 : f32 to vector<2x96xf32>
    %73 = arith.addf %72, %71 : vector<2x96xf32>
    %74 = arith.divf %72, %73 : vector<2x96xf32>
    %75 = vector.extract_strided_slice %68 {offsets = [0, 96], sizes = [2, 32], strides = [1, 1]} : vector<2x128xf32> to vector<2x32xf32>
    %76 = math.tanh %75 : vector<2x32xf32>
    %77 = vector.extract_strided_slice %74 {offsets = [0, 0], sizes = [2, 32], strides = [1, 1]} : vector<2x96xf32> to vector<2x32xf32>
    %78 = vector.extract_strided_slice %74 {offsets = [0, 32], sizes = [2, 32], strides = [1, 1]} : vector<2x96xf32> to vector<2x32xf32>
    %79 = vector.extract_strided_slice %74 {offsets = [0, 64], sizes = [2, 32], strides = [1, 1]} : vector<2x96xf32> to vector<2x32xf32>
    %80 = arith.mulf %78, %63 : vector<2x32xf32>
    %81 = arith.mulf %77, %76 : vector<2x32xf32>
    %82 = arith.addf %80, %81 : vector<2x32xf32>
    %83 = math.tanh %82 : vector<2x32xf32>
    %84 = arith.mulf %79, %83 : vector<2x32xf32>
    %85 = vector.extract_strided_slice %6 {offsets = [8, 0], sizes = [2, 128], strides = [1, 1]} : vector<16x128xf32> to vector<2x128xf32>
    %cst_17 = arith.constant dense<0.000000e+00> : vector<2x128xf32>
    %86 = tpu.matmul %84, %0, %cst_17 {dimension_numbers = #tpu.dot_dimension_numbers<[1], [0], [0], [1], [0, 0, 1, 1], [], []>} : vector<2x32xf32>, vector<32x128xf32>, vector<2x128xf32> -> vector<2x128xf32>
    %87 = arith.addf %85, %86 : vector<2x128xf32>
    %88 = vector.extract_strided_slice %87 {offsets = [0, 0], sizes = [2, 96], strides = [1, 1]} : vector<2x128xf32> to vector<2x96xf32>
    %89 = arith.negf %88 : vector<2x96xf32>
    %90 = math.exp %89 : vector<2x96xf32>
    %cst_18 = arith.constant 1.000000e+00 : f32
    %91 = vector.broadcast %cst_18 : f32 to vector<2x96xf32>
    %92 = arith.addf %91, %90 : vector<2x96xf32>
    %93 = arith.divf %91, %92 : vector<2x96xf32>
    %94 = vector.extract_strided_slice %87 {offsets = [0, 96], sizes = [2, 32], strides = [1, 1]} : vector<2x128xf32> to vector<2x32xf32>
    %95 = math.tanh %94 : vector<2x32xf32>
    %96 = vector.extract_strided_slice %93 {offsets = [0, 0], sizes = [2, 32], strides = [1, 1]} : vector<2x96xf32> to vector<2x32xf32>
    %97 = vector.extract_strided_slice %93 {offsets = [0, 32], sizes = [2, 32], strides = [1, 1]} : vector<2x96xf32> to vector<2x32xf32>
    %98 = vector.extract_strided_slice %93 {offsets = [0, 64], sizes = [2, 32], strides = [1, 1]} : vector<2x96xf32> to vector<2x32xf32>
    %99 = arith.mulf %97, %82 : vector<2x32xf32>
    %100 = arith.mulf %96, %95 : vector<2x32xf32>
    %101 = arith.addf %99, %100 : vector<2x32xf32>
    %102 = math.tanh %101 : vector<2x32xf32>
    %103 = arith.mulf %98, %102 : vector<2x32xf32>
    %104 = vector.extract_strided_slice %6 {offsets = [10, 0], sizes = [2, 128], strides = [1, 1]} : vector<16x128xf32> to vector<2x128xf32>
    %cst_19 = arith.constant dense<0.000000e+00> : vector<2x128xf32>
    %105 = tpu.matmul %103, %0, %cst_19 {dimension_numbers = #tpu.dot_dimension_numbers<[1], [0], [0], [1], [0, 0, 1, 1], [], []>} : vector<2x32xf32>, vector<32x128xf32>, vector<2x128xf32> -> vector<2x128xf32>
    %106 = arith.addf %104, %105 : vector<2x128xf32>
    %107 = vector.extract_strided_slice %106 {offsets = [0, 0], sizes = [2, 96], strides = [1, 1]} : vector<2x128xf32> to vector<2x96xf32>
    %108 = arith.negf %107 : vector<2x96xf32>
    %109 = math.exp %108 : vector<2x96xf32>
    %cst_20 = arith.constant 1.000000e+00 : f32
    %110 = vector.broadcast %cst_20 : f32 to vector<2x96xf32>
    %111 = arith.addf %110, %109 : vector<2x96xf32>
    %112 = arith.divf %110, %111 : vector<2x96xf32>
    %113 = vector.extract_strided_slice %106 {offsets = [0, 96], sizes = [2, 32], strides = [1, 1]} : vector<2x128xf32> to vector<2x32xf32>
    %114 = math.tanh %113 : vector<2x32xf32>
    %115 = vector.extract_strided_slice %112 {offsets = [0, 0], sizes = [2, 32], strides = [1, 1]} : vector<2x96xf32> to vector<2x32xf32>
    %116 = vector.extract_strided_slice %112 {offsets = [0, 32], sizes = [2, 32], strides = [1, 1]} : vector<2x96xf32> to vector<2x32xf32>
    %117 = vector.extract_strided_slice %112 {offsets = [0, 64], sizes = [2, 32], strides = [1, 1]} : vector<2x96xf32> to vector<2x32xf32>
    %118 = arith.mulf %116, %101 : vector<2x32xf32>
    %119 = arith.mulf %115, %114 : vector<2x32xf32>
    %120 = arith.addf %118, %119 : vector<2x32xf32>
    %121 = math.tanh %120 : vector<2x32xf32>
    %122 = arith.mulf %117, %121 : vector<2x32xf32>
    %123 = vector.extract_strided_slice %6 {offsets = [12, 0], sizes = [2, 128], strides = [1, 1]} : vector<16x128xf32> to vector<2x128xf32>
    %cst_21 = arith.constant dense<0.000000e+00> : vector<2x128xf32>
    %124 = tpu.matmul %122, %0, %cst_21 {dimension_numbers = #tpu.dot_dimension_numbers<[1], [0], [0], [1], [0, 0, 1, 1], [], []>} : vector<2x32xf32>, vector<32x128xf32>, vector<2x128xf32> -> vector<2x128xf32>
    %125 = arith.addf %123, %124 : vector<2x128xf32>
    %126 = vector.extract_strided_slice %125 {offsets = [0, 0], sizes = [2, 96], strides = [1, 1]} : vector<2x128xf32> to vector<2x96xf32>
    %127 = arith.negf %126 : vector<2x96xf32>
    %128 = math.exp %127 : vector<2x96xf32>
    %cst_22 = arith.constant 1.000000e+00 : f32
    %129 = vector.broadcast %cst_22 : f32 to vector<2x96xf32>
    %130 = arith.addf %129, %128 : vector<2x96xf32>
    %131 = arith.divf %129, %130 : vector<2x96xf32>
    %132 = vector.extract_strided_slice %125 {offsets = [0, 96], sizes = [2, 32], strides = [1, 1]} : vector<2x128xf32> to vector<2x32xf32>
    %133 = math.tanh %132 : vector<2x32xf32>
    %134 = vector.extract_strided_slice %131 {offsets = [0, 0], sizes = [2, 32], strides = [1, 1]} : vector<2x96xf32> to vector<2x32xf32>
    %135 = vector.extract_strided_slice %131 {offsets = [0, 32], sizes = [2, 32], strides = [1, 1]} : vector<2x96xf32> to vector<2x32xf32>
    %136 = vector.extract_strided_slice %131 {offsets = [0, 64], sizes = [2, 32], strides = [1, 1]} : vector<2x96xf32> to vector<2x32xf32>
    %137 = arith.mulf %135, %120 : vector<2x32xf32>
    %138 = arith.mulf %134, %133 : vector<2x32xf32>
    %139 = arith.addf %137, %138 : vector<2x32xf32>
    %140 = math.tanh %139 : vector<2x32xf32>
    %141 = arith.mulf %136, %140 : vector<2x32xf32>
    %142 = vector.extract_strided_slice %6 {offsets = [14, 0], sizes = [2, 128], strides = [1, 1]} : vector<16x128xf32> to vector<2x128xf32>
    %cst_23 = arith.constant dense<0.000000e+00> : vector<2x128xf32>
    %143 = tpu.matmul %141, %0, %cst_23 {dimension_numbers = #tpu.dot_dimension_numbers<[1], [0], [0], [1], [0, 0, 1, 1], [], []>} : vector<2x32xf32>, vector<32x128xf32>, vector<2x128xf32> -> vector<2x128xf32>
    %144 = arith.addf %142, %143 : vector<2x128xf32>
    %145 = vector.extract_strided_slice %144 {offsets = [0, 0], sizes = [2, 96], strides = [1, 1]} : vector<2x128xf32> to vector<2x96xf32>
    %146 = arith.negf %145 : vector<2x96xf32>
    %147 = math.exp %146 : vector<2x96xf32>
    %cst_24 = arith.constant 1.000000e+00 : f32
    %148 = vector.broadcast %cst_24 : f32 to vector<2x96xf32>
    %149 = arith.addf %148, %147 : vector<2x96xf32>
    %150 = arith.divf %148, %149 : vector<2x96xf32>
    %151 = vector.extract_strided_slice %144 {offsets = [0, 96], sizes = [2, 32], strides = [1, 1]} : vector<2x128xf32> to vector<2x32xf32>
    %152 = math.tanh %151 : vector<2x32xf32>
    %153 = vector.extract_strided_slice %150 {offsets = [0, 0], sizes = [2, 32], strides = [1, 1]} : vector<2x96xf32> to vector<2x32xf32>
    %154 = vector.extract_strided_slice %150 {offsets = [0, 32], sizes = [2, 32], strides = [1, 1]} : vector<2x96xf32> to vector<2x32xf32>
    %155 = vector.extract_strided_slice %150 {offsets = [0, 64], sizes = [2, 32], strides = [1, 1]} : vector<2x96xf32> to vector<2x32xf32>
    %156 = arith.mulf %154, %139 : vector<2x32xf32>
    %157 = arith.mulf %153, %152 : vector<2x32xf32>
    %158 = arith.addf %156, %157 : vector<2x32xf32>
    %159 = math.tanh %158 : vector<2x32xf32>
    %160 = arith.mulf %155, %159 : vector<2x32xf32>
    %c0_25 = arith.constant 0 : index
    %c0_26 = arith.constant 0 : index
    %161 = vector.load %arg4[%c0_25, %c0_26] : memref<2x32xf32, #tpu.memory_space<vmem>>, vector<2x32xf32>
    tpu.vector_store %arg4[%c0_25, %c0_26], %160 {strides = array<i32>} : memref<2x32xf32, #tpu.memory_space<vmem>>, vector<2x32xf32>,
    return
  }
}

</mosaic_0001>

<bundles_post_ra>
// kernel: tpu_custom_call.1
= control target key start
LH: loop header
LB: loop body
LE: loop exit
PB: predicated region body
PF: predicated region fallthrough
CT: control target
= control target key end

     0   :  { %9 = vsyncpa [#allocation3], 0  ;;  %s1644_s0 = inlined_call_operand.hbm [shape: f32[16,64], index: 0, kind: input, shape index: {}]   ;;  %s1645_s1 = inlined_call_operand.hbm [shape: f32[64,128], index: 1, kind: input, shape index: {}]   ;;  %s1646_s2 = inlined_call_operand.hbm [shape: f32[32,128], index: 2, kind: input, shape index: {}]   ;;  %s1647_s3 = inlined_call_operand.vmem [shape: f32[1,128], index: 3, kind: input, shape index: {}]   ;;  %s1648_s4 = inlined_call_operand.hbm [shape: f32[2,32], index: 4, kind: output, shape index: {}]  }
   0x1   :  { %10 = vsyncpa [#allocation6], 0 }
   0x2   :  { %11 = vsyncpa [#allocation4], 0  ;;  %s1435_s15 = smov [#allocation5]   ;;  %s1436_s17 = smov [#allocation2]  }
   0x3   :  { %s29_s16 = sshll.u32 %s1435_s15, 4  ;;  %s17_s18 = sshll.u32 %s1436_s17, 4  ;;  %s30_s16 = int_to_ptr.vmem [resolvable:$true] %s29_s16  ;;  %s1471_s18 = int_to_ptr.vmem [resolvable:$true] %s17_s18 }
   0x4   :  { %s1341_s21 = scalar_lea.hbm %s1645_s1, 1024 }
   0x5   :  { %p1342_p0 = scmp.ne.s32.totalorder %s1645_s1, %s1341_s21  ;;  %p1345_p1 = scmp.lt.u32.totalorder %s1341_s21, %s1645_s1 }
   0x7   :  { %p1347_p2 = pnand %p1345_p1, %p1342_p0 }
   0x9   :  { %1350 = shalt.err (!%p1347_p2)
}
   0xa   :  { %s1351_s26 = scalar_lea.vmem %s30_s16, 1024  ;;  %p1356_p4 = scmp.lt.s32.totalorder %s30_s16, %s30_s16 }
   0xb   :  { %p1352_p3 = scmp.ne.s32.totalorder %s30_s16, %s1351_s26  ;;  %p1357_p5 = scmp.lt.s32.totalorder %s1351_s26, %s1351_s26 }
   0xd   :  { %p1358_p6 = por %p1357_p5, %p1356_p4 }
   0xf   :  { %p1359_p7 = pnand %p1358_p6, %p1352_p3 }
  0x11   :  { %1362 = shalt.err (!%p1359_p7)
}
  0x12   :  { %s1437_s27 = smov 128   ;;  %s1438_s28 = smov 8  }
  0x13   :  { %35 = dma.hbm_to_vmem [thread:$0]  %s1645_s1, 1024, %s30_s16, [#allocation6], %s1437_s27, %s1437_s27, %s1438_s28  }
  0x14   :  { %s1363_s7 = scalar_lea.hbm %s1644_s0, 256 }
  0x15   :  { %p1364_p8 = scmp.ne.s32.totalorder %s1644_s0, %s1363_s7  ;;  %p1367_p9 = scmp.lt.u32.totalorder %s1363_s7, %s1644_s0 }
  0x17   :  { %p1369_p10 = pnand %p1367_p9, %p1364_p8 }
  0x19   :  { %1372 = shalt.err (!%p1369_p10)
}
  0x1a   :  { %s1373_s12 = scalar_lea.vmem %s1471_s18, 256  ;;  %p1378_p12 = scmp.lt.s32.totalorder %s1471_s18, %s1471_s18 }
  0x1b   :  { %p1374_p11 = scmp.ne.s32.totalorder %s1471_s18, %s1373_s12  ;;  %p1379_p13 = scmp.lt.s32.totalorder %s1373_s12, %s1373_s12 }
  0x1d   :  { %p1380_p0 = por %p1379_p13, %p1378_p12 }
  0x1f   :  { %p1381_p1 = pnand %p1380_p0, %p1374_p11 }
  0x21   :  { %1384 = shalt.err (!%p1381_p1)
}
  0x22   :  { %23 = dma.hbm_to_vmem [thread:$0]  %s1644_s0, 256, %s1471_s18, [#allocation3], %s1437_s27, %s1437_s27, %s1438_s28  }
  0x23   :  { %s1439_s14 = smov [#allocation7]   ;;  %s1385_s19 = scalar_lea.hbm %s1646_s2, 512 }
  0x24   :  { %s41_s15 = sshll.u32 %s1439_s14, 4  ;;  %p1386_p2 = scmp.ne.s32.totalorder %s1646_s2, %s1385_s19  ;;  %s42_s15 = int_to_ptr.vmem [resolvable:$true] %s41_s15 }
  0x25   :  { %p1389_p3 = scmp.lt.u32.totalorder %s1385_s19, %s1646_s2 }
  0x27   :  { %p1391_p4 = pnand %p1389_p3, %p1386_p2 }
  0x29   :  { %1394 = shalt.err (!%p1391_p4)
}
  0x2a   :  { %s1395_s24 = scalar_lea.vmem %s42_s15, 512  ;;  %p1400_p6 = scmp.lt.s32.totalorder %s42_s15, %s42_s15 }
  0x2b   :  { %p1396_p5 = scmp.ne.s32.totalorder %s42_s15, %s1395_s24  ;;  %p1401_p7 = scmp.lt.s32.totalorder %s1395_s24, %s1395_s24 }
  0x2d   :  { %p1402_p8 = por %p1401_p7, %p1400_p6 }
  0x2f   :  { %p1403_p9 = pnand %p1402_p8, %p1396_p5 }
  0x31   :  { %1406 = shalt.err (!%p1403_p9)
}
  0x32   :  { %47 = dma.hbm_to_vmem [thread:$0]  %s1646_s2, 512, %s42_s15, [#allocation6], %s1437_s27, %s1437_s27, %s1438_s28  }
  0x33   :  { %1429 = dma.done.wait [#allocation3], 256  }
  0x34   :  { %1430 = vsyncadd [#allocation3], 4294967040 }
  0x35   :  { %1431 = dma.done.wait [#allocation6], 1536  }
  0x36   :  { %1432 = vsyncadd [#allocation6], 4294965760  ;;  %v1440_v0 = vmov 0.0|0.0   ;;  %vm1441_vm0 = vmmov 0   ;;  %v1442_v1 = vmov 0.0   ;;  %v65_v2 = vld [vmem:[#allocation5] sm:$0xff] }
  0x37   :  { %1218 = vmatprep.subr.bf16.mxu1 %v1440_v0  ;;  %1122 = vmatprep.mubr.msk.f32.mxu1 %vm1441_vm0, %v1442_v1  ;;  %v66_v3 = vld [vmem:[#allocation5 + $0x8] sm:$0xff]  ;;  %v67_v4 = vld [vmem:[#allocation5 + $0x10] sm:$0xff]  ;;  %v68_v6 = vld [vmem:[#allocation5 + $0x18] sm:$0xff]  ;;  %vm80_vm1 = vcmask 523264   ;;  %s1443_s26 = smov 32   ;;  %vm162_vm2 = vcmask 261120  }
  0x38   :  { %v1202_v5 = vpack.c.bf16 %v66_v3, %v65_v2  ;;  %v69_v7 = vld [vmem:[#allocation5 + $0x20] sm:$0xff]  ;;  %v1206_v8 = vpack.c.bf16 %v68_v6, %v67_v4  ;;  %v70_v9 = vld [vmem:[#allocation5 + $0x28] sm:$0xff]  ;;  %v63_v13 = vld [vmem:[#allocation2] sm:$0xff]  ;;  %s1445_s27 = smov [#allocation8]   ;;  %vm1009_vm3 = vcmask 261126  }
  0x39   :  { %v59_v10 = vld [vmem:[#allocation7] sm:$0xff]  ;;  %v60_v11 = vld [vmem:[#allocation7 + $0x8] sm:$0xff]  ;;  %v61_v14 = vld [vmem:[#allocation7 + $0x10] sm:$0xff]  ;;  %1111 = vmatprep.mubr.msk.f32.mxu0 %vm80_vm1, %v63_v13  ;;  %v1210_v16 = vpack.c.bf16 %v70_v9, %v69_v7  ;;  %s1017_s28 = sshll.u32 %s1445_s27, 4  ;;  %s1018_s28 = int_to_ptr.vmem [resolvable:$true] %s1017_s28 }
  0x3a   :  { %1203 = vmatprep.subr.bf16.mxu0 %v1202_v5  ;;  %v1526_v12 = vpack.c.bf16 %v60_v11, %v59_v10  ;;  %v62_v15 = vld [vmem:[#allocation7 + $0x18] sm:$0xff]  ;;  %v71_v18 = vld [vmem:[#allocation5 + $0x30] sm:$0xff]  ;;  %s1407_s29 = scalar_lea.vmem %s1018_s28, 32  ;;  %p1412_p11 = scmp.lt.s32.totalorder %s1018_s28, %s1018_s28 }
  0x3b   :  { %1205 = vmatpush3.bf16.msra.mxu0 %v1202_v5  ;;  %v1530_v17 = vpack.c.bf16 %v62_v15, %v61_v14  ;;  %v72_v19 = vld [vmem:[#allocation5 + $0x38] sm:$0xff]  ;;  %v1027_v24 = vld [vmem:[%s1647_s3] ss:$0 sm:$0xff]  ;;  %s1444_s3 = smov 64   ;;  %p1408_p10 = scmp.ne.s32.totalorder %s1018_s28, %s1407_s29 }
  0x3c   :  { %1207 = vmatprep.subr.bf16.mxu0 %v1206_v8  ;;  %1220 = vmatpush3.bf16.msra.mxu1 %v1526_v12  ;;  %v1214_v20 = vpack.c.bf16 %v72_v19, %v71_v18  ;;  %v64_v21 = vld [vmem:[#allocation2 + $0x8] sm:$0xff]  ;;  %p1413_p12 = scmp.lt.s32.totalorder %s1407_s29, %s1407_s29 }
  0x3d   :  { %1221 = vmatprep.subr.bf16.mxu1 %v1440_v0 }
  0x3e   :  { %p1414_p13 = por %p1413_p12, %p1412_p11 }
  0x3f   :  { %1209 = vmatpush3.bf16.msra.mxu0 %v1206_v8 }
  0x40   :  { %1211 = vmatprep.subr.bf16.mxu0 %v1210_v16  ;;  %1223 = vmatpush3.bf16.msra.mxu1 %v1530_v17  ;;  %p1415_p0 = pnand %p1414_p13, %p1408_p10 }
  0x41   :  { %1224 = vmatprep.subr.bf16.mxu1 %v1440_v0 }
  0x43   :  { %1213 = vmatpush3.bf16.msra.mxu0 %v1210_v16  ;;  %1123 = vmatmul.mubr.f32.vlgmr.msra.gmra.mrb[0].mxu1 %v1442_v1 }
  0x44   :  { %1215 = vmatprep.subr.bf16.mxu0 %v1214_v20  ;;  %1226 = vmatpush3.bf16.msra.mxu1 %v1526_v12 }
  0x45   :  { %1227 = vmatprep.subr.bf16.mxu1 %v1440_v0  ;;  %1133 = vmatprep.mubr.msk.f32.mxu1 %vm1441_vm0, %v1442_v1 }
  0x47   :  { %1217 = vmatpush3.bf16.msra.mxu0 %v1214_v20 }
  0x48   :  { %1229 = vmatpush3.bf16.msra.mxu1 %v1530_v17  ;;  %1230 = vmatprep.subr.bf16.mxu0 %v1440_v0 }
  0x49   :  { %1236 = vmatprep.subr.bf16.mxu1 %v1440_v0 }
  0x4a   :  { %1112 = vmatmul.mubr.msk.f32.vlgmr.msra.gmra.mrb[0].mxu0 %vm80_vm1, %v64_v21 }
  0x4b   :  { %1232 = vmatpush3.bf16.msra.mxu0 %v1526_v12  ;;  %1144 = vmatprep.mubr.msk.f32.mxu0 %vm1441_vm0, %v1442_v1 }
  0x4c   :  { %1233 = vmatprep.subr.bf16.mxu0 %v1440_v0 }
  0x4f   :  { %1235 = vmatpush3.bf16.msra.mxu0 %v1530_v17 }
  0x50   :  { %1242 = vmatprep.subr.bf16.mxu0 %v1440_v0 }
 0x116   :  { %v232_v22 = vpop.f32.mrb[0].mxu1 }
 0x117   :  { %v1124_v23 = vpop.f32.mrb[1].mxu1 }
 0x11d   :  { %v1113_v25 = vpop.f32.mrb[0].mxu0 }
 0x11e   :  { %v1553_v26 = vadd.f32 %v1113_v25, %v1027_v24  ;;  %v153_v27 = vpop.f32.mrb[1].mxu0 }
 0x11f   :  { %v1555_v28 = vadd.f32 %v1027_v24, %v153_v27 }
 0x121   :  { %v236_v29 = vadd.f32 %v232_v22, %v1555_v28 }
 0x123   :  { %1277 = vtanh.f32 %v236_v29  ;;  %v1030_v31 = vmul.f32 -1.442695, %v236_v29 }
 0x125   :  { %1279 = vpow2.f32 %v1030_v31 }
 0x12d   :  { %v1278_v30 = vpop.eup %1277 }
 0x12e   :  { %246 = vrot.lane.b32.xlu0 %v1278_v30, %s1443_s26 }
 0x12f   :  { %v1280_v32 = vpop.eup %1279 }
 0x130   :  { %v240_v33 = vadd.f32 1.0, %v1280_v32 }
 0x132   :  { %1281 = vrcp.f32 %v240_v33 }
 0x13c   :  { %v1282_v34 = vpop.eup %1281 }
 0x13d   :  { %v244_v37 = vmul.f32 0.0, %v1282_v34 }
 0x1a0   :  { %v247_v35 = vpop.permute.xlu0 %246 }
 0x1a1   :  { %v249_v36 = vmul.f32 %v1282_v34, %v247_v35 }
 0x1a3   :  { %251 = vrot.lane.b32.xlu0 %v249_v36, %s1443_s26 }
 0x215   :  { %v252_v38 = vpop.permute.xlu0 %251 }
 0x216   :  { %v254_v39 = vadd.f32 %v252_v38, %v244_v37 }
 0x218   :  { %1283 = vtanh.f32 %v254_v39  ;;  %v348_v55 = vrot.slane %v254_v39, 6 }
 0x222   :  { %v1284_v40 = vpop.eup %1283 }
 0x223   :  { %257 = vrot.lane.b32.xlu1 %v1284_v40, %s1443_s26 }
 0x295   :  { %v258_v41 = vpop.permute.xlu1 %257 }
 0x296   :  { %v260_v42 = vmul.f32 %v1282_v34, %v258_v41 }
 0x298   :  { %262 = vrot.lane.b32.xlu1 %v260_v42, %s1444_s3 }
 0x30a   :  { %v263_v43 = vpop.permute.xlu1 %262 }
 0x30b   :  { %1134 = vmatmul.mubr.msk.f32.vlgmr.msra.gmra.mrb[2].mxu1 %vm162_vm2, %v263_v43 }
 0x30c   :  { %1238 = vmatpush3.bf16.msra.mxu1 %v1526_v12  ;;  %1155 = vmatprep.mubr.msk.f32.mxu1 %vm1441_vm0, %v1442_v1 }
 0x30d   :  { %1239 = vmatprep.subr.bf16.mxu1 %v1440_v0 }
 0x310   :  { %1241 = vmatpush3.bf16.msra.mxu1 %v1530_v17 }
 0x311   :  { %1248 = vmatprep.subr.bf16.mxu1 %v1440_v0 }
 0x3de   :  { %v332_v44 = vpop.f32.mrb[2].mxu1 }
 0x3df   :  { %v337_v45 = vrot.slane %v332_v44, 6  ;;  %v1135_v46 = vpop.f32.mrb[3].mxu1 }
 0x3e1   :  { %v339_v47 = vadd.f32 %v337_v45, %v1555_v28 }
 0x3e3   :  { %1285 = vtanh.f32 %v339_v47  ;;  %v1032_v49 = vmul.f32 -1.442695, %v339_v47 }
 0x3e5   :  { %1287 = vpow2.f32 %v1032_v49 }
 0x3ed   :  { %v1286_v48 = vpop.eup %1285 }
 0x3ee   :  { %352 = vrot.lane.b32.xlu0 %v1286_v48, %s1443_s26 }
 0x3ef   :  { %v1288_v50 = vpop.eup %1287 }
 0x3f0   :  { %v343_v51 = vadd.f32 1.0, %v1288_v50 }
 0x3f2   :  { %1289 = vrcp.f32 %v343_v51 }
 0x3fc   :  { %v1290_v52 = vpop.eup %1289 }
 0x3fd   :  { %v350_v56 = vmul.f32 %v1290_v52, %v348_v55 }
 0x460   :  { %v353_v53 = vpop.permute.xlu0 %352 }
 0x461   :  { %v355_v54 = vmul.f32 %v1290_v52, %v353_v53 }
 0x463   :  { %357 = vrot.lane.b32.xlu1 %v355_v54, %s1443_s26 }
 0x4d5   :  { %v358_v57 = vpop.permute.xlu1 %357 }
 0x4d6   :  { %v360_v58 = vadd.f32 %v358_v57, %v350_v56 }
 0x4d8   :  { %1291 = vtanh.f32 %v360_v58  ;;  %v455_v14 = vrot.slane %v360_v58, 6 }
 0x4e2   :  { %v1292_v59 = vpop.eup %1291 }
 0x4e3   :  { %363 = vrot.lane.b32.xlu0 %v1292_v59, %s1443_s26 }
 0x555   :  { %v364_v60 = vpop.permute.xlu0 %363 }
 0x556   :  { %v366_v61 = vmul.f32 %v1290_v52, %v364_v60 }
 0x558   :  { %v368_v62 = vrot.slane %v366_v61, 2 }
 0x55a   :  { %369 = vrot.lane.b32.xlu1 %v368_v62, %s1444_s3 }
 0x5cc   :  { %v370_v63 = vpop.permute.xlu1 %369 }
 0x5cd   :  { %1145 = vmatmul.mubr.msk.f32.vlgmr.msra.gmra.mrb[2].mxu0 %vm162_vm2, %v370_v63 }
 0x5ce   :  { %1244 = vmatpush3.bf16.msra.mxu0 %v1526_v12  ;;  %1166 = vmatprep.mubr.msk.f32.mxu0 %vm1441_vm0, %v1442_v1 }
 0x5cf   :  { %1245 = vmatprep.subr.bf16.mxu0 %v1440_v0 }
 0x5d2   :  { %1247 = vmatpush3.bf16.msra.mxu0 %v1530_v17 }
 0x5d3   :  { %1254 = vmatprep.subr.bf16.mxu0 %v1440_v0 }
 0x6a0   :  { %v439_v2 = vpop.f32.mrb[2].mxu0 }
 0x6a1   :  { %v444_v3 = vrot.slane %v439_v2, 4  ;;  %v1146_v4 = vpop.f32.mrb[3].mxu0 }
 0x6a3   :  { %v446_v5 = vadd.f32 %v444_v3, %v1555_v28 }
 0x6a5   :  { %1293 = vtanh.f32 %v446_v5  ;;  %v1034_v7 = vmul.f32 -1.442695, %v446_v5 }
 0x6a7   :  { %1295 = vpow2.f32 %v1034_v7 }
 0x6af   :  { %v1294_v6 = vpop.eup %1293 }
 0x6b0   :  { %459 = vrot.lane.b32.xlu0 %v1294_v6, %s1443_s26 }
 0x6b1   :  { %v1296_v8 = vpop.eup %1295 }
 0x6b2   :  { %v450_v9 = vadd.f32 1.0, %v1296_v8 }
 0x6b4   :  { %1297 = vrcp.f32 %v450_v9 }
 0x6be   :  { %v1298_v10 = vpop.eup %1297 }
 0x6bf   :  { %v457_v15 = vmul.f32 %v1298_v10, %v455_v14 }
 0x722   :  { %v460_v11 = vpop.permute.xlu0 %459 }
 0x723   :  { %v462_v13 = vmul.f32 %v1298_v10, %v460_v11 }
 0x725   :  { %464 = vrot.lane.b32.xlu1 %v462_v13, %s1443_s26 }
 0x797   :  { %v465_v16 = vpop.permute.xlu1 %464 }
 0x798   :  { %v467_v18 = vadd.f32 %v465_v16, %v457_v15 }
 0x79a   :  { %1299 = vtanh.f32 %v467_v18  ;;  %v562_v37 = vrot.slane %v467_v18, 6 }
 0x7a4   :  { %v1300_v19 = vpop.eup %1299 }
 0x7a5   :  { %470 = vrot.lane.b32.xlu0 %v1300_v19, %s1443_s26 }
 0x817   :  { %v471_v20 = vpop.permute.xlu0 %470 }
 0x818   :  { %v473_v21 = vmul.f32 %v1298_v10, %v471_v20 }
 0x81a   :  { %v475_v22 = vrot.slane %v473_v21, 4 }
 0x81c   :  { %476 = vrot.lane.b32.xlu1 %v475_v22, %s1444_s3 }
 0x88e   :  { %v477_v23 = vpop.permute.xlu1 %476 }
 0x88f   :  { %1156 = vmatmul.mubr.msk.f32.vlgmr.msra.gmra.mrb[4].mxu1 %vm162_vm2, %v477_v23 }
 0x890   :  { %1250 = vmatpush3.bf16.msra.mxu1 %v1526_v12  ;;  %1177 = vmatprep.mubr.msk.f32.mxu1 %vm1441_vm0, %v1442_v1 }
 0x891   :  { %1251 = vmatprep.subr.bf16.mxu1 %v1440_v0 }
 0x894   :  { %1253 = vmatpush3.bf16.msra.mxu1 %v1530_v17 }
 0x895   :  { %1260 = vmatprep.subr.bf16.mxu1 %v1440_v0 }
 0x962   :  { %v546_v24 = vpop.f32.mrb[4].mxu1 }
 0x963   :  { %v551_v25 = vrot.slane %v546_v24, 2  ;;  %v1157_v27 = vpop.f32.mrb[5].mxu1 }
 0x965   :  { %v553_v29 = vadd.f32 %v551_v25, %v1555_v28 }
 0x967   :  { %1301 = vtanh.f32 %v553_v29  ;;  %v1036_v31 = vmul.f32 -1.442695, %v553_v29 }
 0x969   :  { %1303 = vpow2.f32 %v1036_v31 }
 0x971   :  { %v1302_v30 = vpop.eup %1301 }
 0x972   :  { %566 = vrot.lane.b32.xlu0 %v1302_v30, %s1443_s26 }
 0x973   :  { %v1304_v32 = vpop.eup %1303 }
 0x974   :  { %v557_v33 = vadd.f32 1.0, %v1304_v32 }
 0x976   :  { %1305 = vrcp.f32 %v557_v33 }
 0x980   :  { %v1306_v34 = vpop.eup %1305 }
 0x981   :  { %v564_v38 = vmul.f32 %v1306_v34, %v562_v37 }
 0x9e4   :  { %v567_v35 = vpop.permute.xlu0 %566 }
 0x9e5   :  { %v569_v36 = vmul.f32 %v1306_v34, %v567_v35 }
 0x9e7   :  { %571 = vrot.lane.b32.xlu1 %v569_v36, %s1443_s26 }
 0xa59   :  { %v572_v39 = vpop.permute.xlu1 %571 }
 0xa5a   :  { %v574_v40 = vadd.f32 %v572_v39, %v564_v38 }
 0xa5c   :  { %1307 = vtanh.f32 %v574_v40  ;;  %v666_v55 = vrot.slane %v574_v40, 6 }
 0xa66   :  { %v1308_v28 = vpop.eup %1307 }
 0xa67   :  { %577 = vrot.lane.b32.xlu0 %v1308_v28, %s1443_s26 }
 0xad9   :  { %v578_v41 = vpop.permute.xlu0 %577 }
 0xada   :  { %v580_v42 = vmul.f32 %v1306_v34, %v578_v41 }
 0xadc   :  { %v582_v43 = vrot.slane %v580_v42, 6 }
 0xade   :  { %583 = vrot.lane.b32.xlu1 %v582_v43, %s1444_s3 }
 0xb50   :  { %v584_v44 = vpop.permute.xlu1 %583 }
 0xb51   :  { %1167 = vmatmul.mubr.msk.f32.vlgmr.msra.gmra.mrb[4].mxu0 %vm162_vm2, %v584_v44 }
 0xb52   :  { %1256 = vmatpush3.bf16.msra.mxu0 %v1526_v12  ;;  %1188 = vmatprep.mubr.msk.f32.mxu0 %vm1441_vm0, %v1442_v1 }
 0xb53   :  { %1257 = vmatprep.subr.bf16.mxu0 %v1440_v0 }
 0xb56   :  { %1259 = vmatpush3.bf16.msra.mxu0 %v1530_v17 }
 0xc24   :  { %v653_v45 = vpop.f32.mrb[4].mxu0 }
 0xc25   :  { %v657_v46 = vadd.f32 %v653_v45, %v1553_v26  ;;  %v1168_v47 = vpop.f32.mrb[5].mxu0 }
 0xc27   :  { %1309 = vtanh.f32 %v657_v46  ;;  %v1038_v49 = vmul.f32 -1.442695, %v657_v46 }
 0xc29   :  { %1311 = vpow2.f32 %v1038_v49 }
 0xc31   :  { %v1310_v48 = vpop.eup %1309 }
 0xc32   :  { %670 = vrot.lane.b32.xlu0 %v1310_v48, %s1443_s26 }
 0xc33   :  { %v1312_v50 = vpop.eup %1311 }
 0xc34   :  { %v661_v51 = vadd.f32 1.0, %v1312_v50 }
 0xc36   :  { %1313 = vrcp.f32 %v661_v51 }
 0xc40   :  { %v1314_v52 = vpop.eup %1313 }
 0xc41   :  { %v668_v56 = vmul.f32 %v1314_v52, %v666_v55 }
 0xca4   :  { %v671_v53 = vpop.permute.xlu0 %670 }
 0xca5   :  { %v673_v54 = vmul.f32 %v1314_v52, %v671_v53 }
 0xca7   :  { %675 = vrot.lane.b32.xlu1 %v673_v54, %s1443_s26 }
 0xd19   :  { %v676_v57 = vpop.permute.xlu1 %675 }
 0xd1a   :  { %v678_v58 = vadd.f32 %v676_v57, %v668_v56 }
 0xd1c   :  { %1315 = vtanh.f32 %v678_v58 }
 0xd26   :  { %v1316_v59 = vpop.eup %1315 }
 0xd27   :  { %681 = vrot.lane.b32.xlu0 %v1316_v59, %s1443_s26 }
 0xd99   :  { %v682_v60 = vpop.permute.xlu0 %681 }
 0xd9a   :  { %v684_v61 = vmul.f32 %v1314_v52, %v682_v60 }
 0xd9c   :  { %686 = vrot.lane.b32.xlu1 %v684_v61, %s1444_s3 }
 0xe0e   :  { %v687_v62 = vpop.permute.xlu1 %686 }
 0xe0f   :  { %1178 = vmatmul.mubr.msk.f32.vlgmr.msra.gmra.mrb[6].mxu1 %vm162_vm2, %v687_v62 }
 0xe10   :  { %1262 = vmatpush3.bf16.msra.mxu1 %v1526_v12  ;;  %1199 = vmatprep.mubr.msk.f32.mxu1 %vm1441_vm0, %v1442_v1 }
 0xe11   :  { %1263 = vmatprep.subr.bf16.mxu1 %v1440_v0  ;;  %v772_v0 = vrot.slane %v678_v58, 6 }
 0xe14   :  { %1265 = vmatpush3.bf16.msra.mxu1 %v1530_v17 }
 0xee2   :  { %v756_v63 = vpop.f32.mrb[6].mxu1 }
 0xee3   :  { %v761_v2 = vrot.slane %v756_v63, 6  ;;  %v1179_v3 = vpop.f32.mrb[7].mxu1 }
 0xee5   :  { %v763_v4 = vadd.f32 %v761_v2, %v1553_v26 }
 0xee7   :  { %1317 = vtanh.f32 %v763_v4  ;;  %v1040_v6 = vmul.f32 -1.442695, %v763_v4 }
 0xee9   :  { %1319 = vpow2.f32 %v1040_v6 }
 0xef1   :  { %v1318_v5 = vpop.eup %1317 }
 0xef2   :  { %776 = vrot.lane.b32.xlu0 %v1318_v5, %s1443_s26 }
 0xef3   :  { %v1320_v7 = vpop.eup %1319 }
 0xef4   :  { %v767_v12 = vadd.f32 1.0, %v1320_v7 }
 0xef6   :  { %1321 = vrcp.f32 %v767_v12 }
 0xf00   :  { %v1322_v8 = vpop.eup %1321 }
 0xf01   :  { %v774_v17 = vmul.f32 %v1322_v8, %v772_v0 }
 0xf64   :  { %v777_v1 = vpop.permute.xlu0 %776 }
 0xf65   :  { %v779_v9 = vmul.f32 %v1322_v8, %v777_v1 }
 0xf67   :  { %781 = vrot.lane.b32.xlu1 %v779_v9, %s1443_s26 }
 0xfd9   :  { %v782_v10 = vpop.permute.xlu1 %781 }
 0xfda   :  { %v784_v11 = vadd.f32 %v782_v10, %v774_v17 }
 0xfdc   :  { %1323 = vtanh.f32 %v784_v11  ;;  %v879_v32 = vrot.slane %v784_v11, 6 }
 0xfe6   :  { %v1324_v13 = vpop.eup %1323 }
 0xfe7   :  { %787 = vrot.lane.b32.xlu0 %v1324_v13, %s1443_s26 }
0x1059   :  { %v788_v14 = vpop.permute.xlu0 %787 }
0x105a   :  { %v790_v15 = vmul.f32 %v1322_v8, %v788_v14 }
0x105c   :  { %v792_v16 = vrot.slane %v790_v15, 2 }
0x105e   :  { %793 = vrot.lane.b32.xlu1 %v792_v16, %s1444_s3 }
0x10d0   :  { %v794_v18 = vpop.permute.xlu1 %793 }
0x10d1   :  { %1189 = vmatmul.mubr.msk.f32.vlgmr.msra.gmra.mrb[6].mxu0 %vm162_vm2, %v794_v18 }
0x11a4   :  { %v863_v19 = vpop.f32.mrb[6].mxu0 }
0x11a5   :  { %v868_v20 = vrot.slane %v863_v19, 4  ;;  %v1190_v21 = vpop.f32.mrb[7].mxu0 }
0x11a7   :  { %v870_v22 = vadd.f32 %v868_v20, %v1553_v26 }
0x11a9   :  { %1325 = vtanh.f32 %v870_v22  ;;  %v1042_v24 = vmul.f32 -1.442695, %v870_v22 }
0x11ab   :  { %1327 = vpow2.f32 %v1042_v24 }
0x11b3   :  { %v1326_v23 = vpop.eup %1325 }
0x11b4   :  { %883 = vrot.lane.b32.xlu0 %v1326_v23, %s1443_s26 }
0x11b5   :  { %v1328_v25 = vpop.eup %1327 }
0x11b6   :  { %v874_v27 = vadd.f32 1.0, %v1328_v25 }
0x11b8   :  { %1329 = vrcp.f32 %v874_v27 }
0x11c2   :  { %v1330_v29 = vpop.eup %1329 }
0x11c3   :  { %v881_v33 = vmul.f32 %v1330_v29, %v879_v32 }
0x1226   :  { %v884_v30 = vpop.permute.xlu0 %883 }
0x1227   :  { %v886_v31 = vmul.f32 %v1330_v29, %v884_v30 }
0x1229   :  { %888 = vrot.lane.b32.xlu1 %v886_v31, %s1443_s26 }
0x129b   :  { %v889_v34 = vpop.permute.xlu1 %888 }
0x129c   :  { %v891_v35 = vadd.f32 %v889_v34, %v881_v33 }
0x129e   :  { %1331 = vtanh.f32 %v891_v35  ;;  %v986_v51 = vrot.slane %v891_v35, 6 }
0x12a8   :  { %v1332_v36 = vpop.eup %1331 }
0x12a9   :  { %894 = vrot.lane.b32.xlu0 %v1332_v36, %s1443_s26 }
0x131b   :  { %v895_v37 = vpop.permute.xlu0 %894 }
0x131c   :  { %v897_v38 = vmul.f32 %v1330_v29, %v895_v37 }
0x131e   :  { %v899_v39 = vrot.slane %v897_v38, 4 }
0x1320   :  { %900 = vrot.lane.b32.xlu1 %v899_v39, %s1444_s3 }
0x1392   :  { %v901_v40 = vpop.permute.xlu1 %900 }
0x1393   :  { %1200 = vmatmul.mubr.msk.f32.vlgmr.msra.gmra.mrb[8].mxu1 %vm162_vm2, %v901_v40 }
0x1466   :  { %v970_v28 = vpop.f32.mrb[8].mxu1 }
0x1467   :  { %v975_v41 = vrot.slane %v970_v28, 2  ;;  %v1201_v42 = vpop.f32.mrb[9].mxu1 }
0x1469   :  { %v977_v43 = vadd.f32 %v975_v41, %v1553_v26 }
0x146b   :  { %1333 = vtanh.f32 %v977_v43  ;;  %v1044_v45 = vmul.f32 -1.442695, %v977_v43 }
0x146d   :  { %1335 = vpow2.f32 %v1044_v45 }
0x1475   :  { %v1334_v44 = vpop.eup %1333 }
0x1476   :  { %990 = vrot.lane.b32.xlu0 %v1334_v44, %s1443_s26 }
0x1477   :  { %v1336_v46 = vpop.eup %1335 }
0x1478   :  { %v981_v47 = vadd.f32 1.0, %v1336_v46 }
0x147a   :  { %1337 = vrcp.f32 %v981_v47 }
0x1484   :  { %v1338_v48 = vpop.eup %1337 }
0x1485   :  { %v988_v52 = vmul.f32 %v1338_v48, %v986_v51 }
0x14e8   :  { %v991_v49 = vpop.permute.xlu0 %990 }
0x14e9   :  { %v993_v50 = vmul.f32 %v1338_v48, %v991_v49 }
0x14eb   :  { %995 = vrot.lane.b32.xlu1 %v993_v50, %s1443_s26 }
0x155d   :  { %v996_v53 = vpop.permute.xlu1 %995 }
0x155e   :  { %v998_v54 = vadd.f32 %v996_v53, %v988_v52 }
0x1560   :  { %1339 = vtanh.f32 %v998_v54 }
0x156a   :  { %v1340_v26 = vpop.eup %1339 }
0x156b   :  { %1001 = vrot.lane.b32.xlu0 %v1340_v26, %s1443_s26 }
0x15dd   :  { %v1002_v55 = vpop.permute.xlu0 %1001 }
0x15de   :  { %v1004_v56 = vmul.f32 %v1338_v48, %v1002_v55 }
0x15e0   :  { %1006 = vrot.lane.b32.xlu1 %v1004_v56, %s1444_s3 }
0x1652   :  { %v1007_v57 = vpop.permute.xlu1 %1006 }
0x1653   :  { %1010 = vst.msk [vmem:[#allocation8 - $0x6] sm:$0xc0] %vm1009_vm3, %v1007_v57 }
0x1654   :  { %1418 = shalt.err (!%p1415_p0)
}
0x1655   :  { %s1419_s6 = scalar_lea.hbm %s1648_s4, 32 }
0x1656   :  { %p1420_p1 = scmp.ne.s32.totalorder %s1648_s4, %s1419_s6  ;;  %p1423_p2 = scmp.lt.u32.totalorder %s1419_s6, %s1648_s4 }
0x1658   :  { %p1425_p3 = pnand %p1423_p2, %p1420_p1 }
0x165a   :  { %1428 = shalt.err (!%p1425_p3)
}
0x165b   :  { %1020 = dma.vmem_to_hbm [thread:$0]  %s1018_s28, 32, %s1648_s4, [#allocation4]  }
0x165c   :  { %1433 = dma.done.wait [#allocation4], 32  }
0x165d   :  { %1434 = vsyncadd [#allocation4], 4294967264 }
0x165e   :  { %1024 = vsyncpa [#allocation3], 1 }
0x165f   :  { %1025 = vsyncpa [#allocation6], 1 }
0x1660   :  { %1026 = vsyncpa [#allocation4], 1 }

</bundles_post_ra>
